<compile_context>
chip_gen: v5e
topology: v5e:2x2
jax: 0.10.0
libtpu: 0.0.40
codegen_flags: <defaults>
</compile_context>

<pallas_src>
import functools

import jax
import jax.numpy as jnp
from jax.experimental import pallas as pl
from jax.experimental.pallas import tpu as pltpu

_LANE = 128
_SUBLANE = 8
_MAX_BLOCK_ROWS = 2048          # (2048, 128) f32 tile = 1 MiB per buffer


def _absmax_kernel(x_ref, amax_ref, *, block_rows, valid_rows):
    """Tiled global abs-max reduction into a (1,1) resident accumulator."""
    i = pl.program_id(0)

    @pl.when(i == 0)
    def _():
        amax_ref[...] = jnp.zeros_like(amax_ref)

    x = x_ref[...].astype(jnp.float32)
    # Mask rows past the end of the array (last tile may be ragged; its
    # out-of-bounds rows contain garbage). 0 is neutral for max(|x|).
    row_ids = i * block_rows + jax.lax.broadcasted_iota(jnp.int32, x.shape, 0)
    ax = jnp.where(row_ids < valid_rows, jnp.abs(x), jnp.float32(0.0))
    amax_ref[...] = jnp.maximum(amax_ref[...], jnp.max(ax))


def _quantize_kernel(scale_ref, x_ref, out_ref, *, qmin, qmax):
    """Elementwise quantize -> round -> clamp for one tile."""
    scale = scale_ref[0]                      # scalar, lives in SMEM
    x = x_ref[...].astype(jnp.float32)        # per-tile cast only
    q = jnp.clip(jnp.round(x * scale), jnp.float32(qmin), jnp.float32(qmax))
    out_ref[...] = q.astype(out_ref.dtype)


def quantizer_forward(x, bits=8):
    """Pallas equivalent of Quantizer.forward for 1 < bits < 32.

    Args:
      x: NCHW float array.
      bits: quantization bit width (2..31).
    Returns:
      (q_output, scale): q_output has the same shape/dtype as x and holds the
      integer-valued quantized codes; scale is a float32 scalar.
    """
    assert bits != 32 and bits != 1, "bits==32/1 paths are degenerate in the reference"
    qmax = float(2 ** (bits - 1) - 1)
    qmin = float(-(2 ** (bits - 1)))

    orig_shape = x.shape
    orig_dtype = x.dtype
    flat = x.reshape(-1)
    n = flat.shape[0]

    # Reshape (free) to a (rows, 128) slab. Pad with zeros only when the
    # element count is not already a multiple of the (8, 128) tile; zeros are
    # neutral for the abs-max pass and the padded output region is sliced off.
    tile = _LANE * _SUBLANE
    pad = (-n) % tile
    if pad:
        flat = jnp.concatenate([flat, jnp.zeros((pad,), flat.dtype)])
    rows = flat.shape[0] // _LANE
    x2d = flat.reshape(rows, _LANE)

    block_rows = min(rows, _MAX_BLOCK_ROWS)   # multiple of 8, or == rows
    grid = (pl.cdiv(rows, block_rows),)

    in_bytes = rows * _LANE * jnp.dtype(orig_dtype).itemsize
    out_bytes = in_bytes

    # ---- pass 1: tiled global abs-max reduction (reduction axis "arbitrary") ----
    amax = pl.pallas_call(
        functools.partial(_absmax_kernel, block_rows=block_rows, valid_rows=rows),
        out_shape=jax.ShapeDtypeStruct((1, 1), jnp.float32),
        grid=grid,
        in_specs=[pl.BlockSpec((block_rows, _LANE), lambda i: (i, 0))],
        out_specs=pl.BlockSpec((1, 1), lambda i: (0, 0)),
        compiler_params=pltpu.CompilerParams(
            dimension_semantics=("arbitrary",)),
        cost_estimate=pl.CostEstimate(
            flops=2 * rows * _LANE, transcendentals=0,
            bytes_accessed=in_bytes + 4),
    )(x2d)

    # scale = (2**(bits-1) - 1) / max(|x|), guarded against all-zero input.
    float_range = jnp.maximum(amax[0, 0], jnp.float32(jnp.finfo(jnp.float32).tiny))
    scale = (jnp.float32(qmax) / float_range).reshape(1)

    # ---- pass 2: tiled elementwise quantize ("parallel" -> megacore sharding) ----
    q2d = pl.pallas_call(
        functools.partial(_quantize_kernel, qmin=qmin, qmax=qmax),
        out_shape=jax.ShapeDtypeStruct((rows, _LANE), orig_dtype),
        grid=grid,
        in_specs=[
            pl.BlockSpec(memory_space=pltpu.MemorySpace.SMEM),     # scale (1,)
            pl.BlockSpec((block_rows, _LANE), lambda i: (i, 0)),   # x tile
        ],
        out_specs=pl.BlockSpec((block_rows, _LANE), lambda i: (i, 0)),
        compiler_params=pltpu.CompilerParams(
            dimension_semantics=("parallel",)),
        cost_estimate=pl.CostEstimate(
            flops=3 * rows * _LANE, transcendentals=0,
            bytes_accessed=in_bytes + out_bytes),
    )(scale, x2d)

    q_out = q2d.reshape(-1)[:n].reshape(orig_shape)
    return q_out, scale[0]


def _reference(x, bits):
    # Pure-JAX reference mirroring the PyTorch semantics, for a sanity check.
    qmax = float(2 ** (bits - 1) - 1)
    qmin = float(-(2 ** (bits - 1)))
    xf = x.astype(jnp.float32)
    float_range = jnp.maximum(jnp.max(jnp.abs(xf)),
                              jnp.float32(jnp.finfo(jnp.float32).tiny))
    scale = jnp.float32(qmax) / float_range
    q = jnp.clip(jnp.round(xf * scale), qmin, qmax).astype(x.dtype)
    return q, scale


if __name__ == "__main__":
    key = jax.random.PRNGKey(0)
    # Small NCHW activation tensor, as fed to the quantizer in the original repo.
    x = jax.random.normal(key, (2, 4, 16, 16), dtype=jnp.float32)

    bits = 8
    q_out, scale = quantizer_forward(x, bits=bits)
    q_out = jax.block_until_ready(q_out)
    scale = jax.block_until_ready(scale)

    q_ref, scale_ref = _reference(x, bits)
    assert q_out.shape == x.shape and q_out.dtype == x.dtype
    assert jnp.allclose(q_out, q_ref), "quantized output mismatch"
    assert jnp.allclose(scale, scale_ref, rtol=1e-6), "scale mismatch"

    print("KERNEL_OK")
</pallas_src>

<mosaic_0001>
module attributes {stable_mosaic.version = 11 : i64} {
  func.func @_absmax_kernel(%arg0: i32, %arg1: memref<16x128xf32, #tpu.memory_space<vmem>>, %arg2: memref<1x1xf32, #tpu.memory_space<vmem>>) attributes {dimension_semantics = [#tpu.dimension_semantics<arbitrary>], iteration_bounds = array<i64: 1>, scalar_prefetch = 0 : i64, scratch_operands = 0 : i64, tpu.core_type = #tpu.core_type<tc>, window_params = [{transform_indices = @transform_0, window_bounds = array<i64: 16, 128>}, {pipeline_mode = #tpu.pipeline_mode<synchronous>, transform_indices = @transform_1, window_bounds = array<i64: 1, 1>}]} {
    %c0_i32 = arith.constant 0 : i32
    %0 = arith.cmpi eq, %arg0, %c0_i32 : i32
    %1 = arith.extui %0 : i1 to i32
    %c0_i32_0 = arith.constant 0 : i32
    %2 = arith.cmpi ne, %1, %c0_i32_0 : i32
    scf.if %2 {
      %cst_8 = arith.constant 0.000000e+00 : f32
      %21 = vector.broadcast %cst_8 : f32 to vector<1x1xf32>
      %c0_9 = arith.constant 0 : index
      %c0_10 = arith.constant 0 : index
      %22 = vector.load %arg2[%c0_9, %c0_10] : memref<1x1xf32, #tpu.memory_space<vmem>>, vector<1x1xf32>
      tpu.vector_store %arg2[%c0_9, %c0_10], %21 {strides = array<i32>} : memref<1x1xf32, #tpu.memory_space<vmem>>, vector<1x1xf32>,
    } else {
    }
    %c0 = arith.constant 0 : index
    %c0_1 = arith.constant 0 : index
    %3 = vector.load %arg1[%c0, %c0_1] : memref<16x128xf32, #tpu.memory_space<vmem>>, vector<16x128xf32>
    %c16_i32 = arith.constant 16 : i32
    %4 = arith.muli %arg0, %c16_i32 : i32
    %5 = tpu.iota {dimensions = array<i32: 0>} : vector<16x128xi32>
    %6 = vector.broadcast %4 : i32 to vector<16x128xi32>
    %7 = arith.addi %6, %5 : vector<16x128xi32>
    %c16_i32_2 = arith.constant 16 : i32
    %8 = vector.broadcast %c16_i32_2 : i32 to vector<16x128xi32>
    %9 = arith.cmpi slt, %7, %8 : vector<16x128xi32>
    %10 = math.absf %3 : vector<16x128xf32>
    %cst = arith.constant 0.000000e+00 : f32
    %11 = vector.broadcast %cst : f32 to vector<16x128xf32>
    %12 = arith.select %9, %10, %11 : vector<16x128xi1>, vector<16x128xf32>
    %c0_3 = arith.constant 0 : index
    %c0_4 = arith.constant 0 : index
    %13 = vector.load %arg2[%c0_3, %c0_4] : memref<1x1xf32, #tpu.memory_space<vmem>>, vector<1x1xf32>
    %14 = vector.shape_cast %12 : vector<16x128xf32> to vector<1x16x128xf32>
    %cst_5 = arith.constant dense<0xFF800000> : vector<1xf32>
    %15 = vector.multi_reduction <maximumf>, %14, %cst_5 [1, 2] : vector<1x16x128xf32> to vector<1xf32>
    %16 = vector.shape_cast %15 : vector<1xf32> to vector<1x1x1xf32>
    %17 = vector.extract %16[0, 0, 0] : f32 from vector<1x1x1xf32>
    %18 = vector.broadcast %17 : f32 to vector<1x1xf32>
    %19 = arith.maximumf %13, %18 : vector<1x1xf32>
    %c0_6 = arith.constant 0 : index
    %c0_7 = arith.constant 0 : index
    %20 = vector.load %arg2[%c0_6, %c0_7] : memref<1x1xf32, #tpu.memory_space<vmem>>, vector<1x1xf32>
    tpu.vector_store %arg2[%c0_6, %c0_7], %19 {strides = array<i32>} : memref<1x1xf32, #tpu.memory_space<vmem>>, vector<1x1xf32>,
    return
  }
  func.func @transform_0(%arg0: i32) -> (i32, i32) {
    %c0_i32 = arith.constant 0 : i32
    %c0_i32_0 = arith.constant 0 : i32
    return %arg0, %c0_i32 : i32, i32
  }
  func.func @transform_1(%arg0: i32) -> (i32, i32) {
    %c0_i32 = arith.constant 0 : i32
    %c0_i32_0 = arith.constant 0 : i32
    %c0_i32_1 = arith.constant 0 : i32
    return %c0_i32, %c0_i32_0 : i32, i32
  }
}

</mosaic_0001>

<bundles_post_ra>
// kernel: tpu_custom_call.1
= control target key start
LH: loop header
LB: loop body
LE: loop exit
PB: predicated region body
PF: predicated region fallthrough
CT: control target
= control target key end

     0   :  { %6 = vsyncpa [#allocation3], 0  ;;  %s160_s0 = inlined_call_operand.hbm [shape: f32[16,128], index: 0, kind: input, shape index: {}]   ;;  %s161_s1 = inlined_call_operand.hbm [shape: f32[1,1], index: 1, kind: output, shape index: {}]  }
   0x1   :  { %7 = vsyncpa [#allocation4], 0  ;;  %s12_s8 = sshll.u32 %s160_s0, 4  ;;  %s137_s9 = smov [#allocation2]   ;;  %s13_s8 = int_to_ptr.hbm [resolvable:$true] %s12_s8 }
   0x2   :  { %s14_s10 = sshll.u32 %s137_s9, 4  ;;  %s138_s11 = smov 128   ;;  %s15_s10 = int_to_ptr.vmem [resolvable:$true] %s14_s10 }
   0x3   :  { %s139_s12 = smov 8  }
   0x4   :  { %20 = dma.hbm_to_vmem [thread:$0]  %s13_s8, 256, %s15_s10, [#allocation3], %s138_s11, %s138_s11, %s139_s12  }
   0x5   :  { %133 = dma.done.wait [#allocation3], 256  }
   0x6   :  { %134 = vsyncadd [#allocation3], 4294967040  ;;  %vm29_vm0 = vcmask 0   ;;  %v140_v0 = vmov 0.0   ;;  %v31_v1 = vld [vmem:[#allocation2] sm:$0xff]  ;;  %v32_v2 = vld [vmem:[#allocation2 + $0x8] sm:$0xff] }
   0x7   :  { %30 = vst.msk [vmem:[#allocation5] sm:$0x1] %vm29_vm0, %v140_v0  ;;  %v42_v3 = vand.u32 2147483647, %v31_v1  ;;  %v43_v4 = vand.u32 2147483647, %v32_v2 }
   0x8   :  { %s141_s0 = smov [#allocation5]   ;;  %s68_s16 = sshll.u32 %s161_s1, 4  ;;  %s69_s16 = int_to_ptr.hbm [resolvable:$true] %s68_s16 }
   0x9   :  { %v47_v5 = vmax.f32 %v42_v3, %v43_v4  ;;  %s66_s13 = sshll.u32 %s141_s0, 4  ;;  %s67_s13 = int_to_ptr.vmem [resolvable:$true] %s66_s13 }
   0xb   :  { %48 = vmax.xlane.f32.xlu0 %v47_v5 }
   0xe   :  { %v46_v13 = vld [vmem:[#allocation5] sm:$0x1] }
  0x7e   :  { %v49_v6 = vpop.xlane.xlu0 %48 }
  0x7f   :  { %v50_v7 = vrot.slane %v49_v6, 4 }
  0x81   :  { %v51_v8 = vmax.f32 %v49_v6, %v50_v7 }
  0x83   :  { %v52_v9 = vrot.slane %v51_v8, 2 }
  0x85   :  { %v53_v10 = vmax.f32 %v51_v8, %v52_v9 }
  0x87   :  { %v54_v11 = vrot.slane %v53_v10, 1 }
  0x89   :  { %v55_v12 = vmax.f32 %v53_v10, %v54_v11 }
  0x8b   :  { %78 = vpush %v55_v12 }
  0xbc   :  { %s79_s17 = spop %78 }
  0xbd   :  { %v57_v14 = vstv %s79_s17 }
  0xbe   :  { %v58_v15 = vmax.f32 %v46_v13, %v57_v14 }
  0xc0   :  { %60 = vst.msk [vmem:[#allocation5] sm:$0x1] %vm29_vm0, %v58_v15 }
  0xc1   :  { %71 = dma.vmem_to_hbm [thread:$0]  %s67_s13, 16, %s69_s16, [#allocation4]  }
  0xc2   :  { %135 = dma.done.wait [#allocation4], 16  }
  0xc3   :  { %136 = vsyncadd [#allocation4], 4294967280 }
  0xc4   :  { %76 = vsyncpa [#allocation3], 1 }
  0xc5   :  { %77 = vsyncpa [#allocation4], 1 }

</bundles_post_ra>
